<compile_context>
chip_gen: v7x
topology: tpu7x:2x2x1
jax: 0.10.0
libtpu: 0.0.40
codegen_flags: <defaults>
</compile_context>

<pallas_src>
import functools
import math

import jax
import jax.numpy as jnp
from jax.experimental import pallas as pl
from jax.experimental.pallas import tpu as pltpu

_MiB = 1024 * 1024


def _round_up(x: int, m: int) -> int:
    return ((x + m - 1) // m) * m


def _physical_vmem_bytes() -> int:
    try:
        info = pltpu.get_tpu_info()
        cap = getattr(info, "vmem_capacity_bytes", None)
        if cap:
            return int(cap)
    except Exception:
        pass
    return 64 * _MiB  # conservative default (v7x per-TensorCore)


def _pick_tile_m(M: int, desired: int) -> int:
    align = 16  # bf16 (16, 128) sublane packing
    Mp = _round_up(M, align)
    if Mp <= align:
        return align
    # Aim for >=2 token tiles so v7x's two TensorCores both get work.
    half = _round_up(max(align, Mp // 2), align)
    return max(align, min(desired, half))


def _pick_tile_f(d_ff: int):
    """Largest lane-aligned tile dividing d_ff; zero-pad d_ff if nothing fits."""
    for t in (512, 384, 256, 128):
        if d_ff % t == 0:
            return t, d_ff
    return 256, _round_up(d_ff, 256)


def _ffn_vmem_bytes(tile_m, d_model, tile_f, nf, fuse_norm):
    act, w, f32 = 2, 2, 4  # bf16 activations/weights, f32 acc/bias
    n_wbuf = 2 if nf > 1 else 1  # constant index_map -> weights stay resident
    need = (2 * tile_m * d_model * act        # x double-buffer
            + 2 * tile_m * d_model * act      # out double-buffer
            + n_wbuf * d_model * tile_f * w   # w1
            + n_wbuf * tile_f * d_model * w   # w2
            + n_wbuf * tile_f * f32           # b1
            + 2 * d_model * f32               # b2
            + tile_m * d_model * f32          # acc scratch
            + tile_m * tile_f * f32)          # relu intermediate
    if fuse_norm:
        need += 2 * 2 * d_model * f32         # alpha / bias
    return need


# ---------------------------------------------------------------------------
# Feed-forward block:  y = relu(x @ w1 + b1) @ w2 + b2     (dropout = eval)
# Optionally fuses the spec's LayerNormalization into the finalize step.
# ---------------------------------------------------------------------------
def ffn_kernel(*refs, fuse_norm, eps, compute_dtype):
    if fuse_norm:
        (x_ref, w1_ref, b1_ref, w2_ref, b2_ref,
         alpha_ref, bias_ref, o_ref, acc_ref) = refs
    else:
        x_ref, w1_ref, b1_ref, w2_ref, b2_ref, o_ref, acc_ref = refs

    f = pl.program_id(1)

    @pl.when(f == 0)
    def _():
        acc_ref[...] = jnp.zeros_like(acc_ref)

    x = x_ref[...].astype(compute_dtype)                       # bf16 MXU operand
    h = jnp.dot(x, w1_ref[...], preferred_element_type=jnp.float32)
    h = jnp.maximum(h + b1_ref[...].astype(jnp.float32), 0.0)  # bias + ReLU in f32
    # nn.Dropout in eval mode == identity.
    # TODO(synk): training-mode stochastic dropout (pltpu.prng_*) not implemented.
    acc_ref[...] += jnp.dot(h.astype(compute_dtype), w2_ref[...],
                            preferred_element_type=jnp.float32)

    @pl.when(f == pl.num_programs(1) - 1)
    def _():
        y = acc_ref[...] + b2_ref[...].astype(jnp.float32)
        if fuse_norm:
            d = y.shape[-1]
            m = jnp.min(y, axis=-1, keepdims=True)   # spec literally uses x.min(dim=-1)
            mu = jnp.mean(y, axis=-1, keepdims=True)
            var = jnp.sum((y - mu) ** 2, axis=-1, keepdims=True) / (d - 1)  # unbiased std
            inv = pl.reciprocal(jnp.sqrt(var) + eps, approx=True)           # EUP slot
            # TODO(synk): the spec's `alpha @ (...)` matmul is shape-invalid for
            # (batch, seq, features); implemented as the elementwise LayerNorm scale.
            y = (alpha_ref[...].astype(jnp.float32) * (y - m) * inv
                 + bias_ref[...].astype(jnp.float32))
        o_ref[...] = y.astype(o_ref.dtype)


def feed_forward_block(x, w1, b1, w2, b2, *, norm_alpha=None, norm_bias=None,
                       eps=1e-6, tile_m=512, compute_dtype=jnp.bfloat16):
    """x: (batch, seq, d_model) -> (batch, seq, d_model) in bf16."""
    batch, seq, d_model = x.shape
    d_ff = w1.shape[1]
    fuse_norm = norm_alpha is not None

    M = batch * seq
    x2d = x.reshape(M, d_model).astype(compute_dtype)

    tile_m = _pick_tile_m(M, tile_m)
    Mp = _round_up(M, tile_m)
    if Mp != M:
        x2d = jnp.pad(x2d, ((0, Mp - M), (0, 0)))
    n_i = Mp // tile_m

    phys_vmem = _physical_vmem_bytes()
    resident_budget = phys_vmem - 16 * _MiB

    # Prefer full weight residency (tile_f = d_ff -> constant index_map,
    # weights DMA'd exactly once); fall back to 128-aligned d_ff tiles.
    tile_f, d_ff_p = d_ff, d_ff
    if (d_ff % 128 != 0
            or _ffn_vmem_bytes(tile_m, d_model, d_ff, 1, fuse_norm) > resident_budget):
        tile_f, d_ff_p = _pick_tile_f(d_ff)
    nf = d_ff_p // tile_f

    if d_ff_p != d_ff:  # zero-padding the hidden dim is mathematically a no-op
        w1 = jnp.pad(w1, ((0, 0), (0, d_ff_p - d_ff)))
        b1 = jnp.pad(b1, ((0, 0), (0, d_ff_p - d_ff)))
        w2 = jnp.pad(w2, ((0, d_ff_p - d_ff), (0, 0)))

    need = _ffn_vmem_bytes(tile_m, d_model, tile_f, nf, fuse_norm)
    vmem_limit = int(min(phys_vmem - 8 * _MiB,
                         max(32 * _MiB, need * 3 // 2 + 8 * _MiB)))

    weight_bytes = (w1.size * w1.dtype.itemsize + w2.size * w2.dtype.itemsize
                    + b1.size * b1.dtype.itemsize + b2.size * b2.dtype.itemsize)
    cost = pl.CostEstimate(
        flops=4 * Mp * d_model * d_ff_p,
        transcendentals=2 * Mp if fuse_norm else 0,
        bytes_accessed=int(2 * Mp * d_model * 2                       # x in + out (bf16)
                           + weight_bytes * (1 if nf == 1 else n_i)   # weight stream
                           + (2 * d_model * 4 if fuse_norm else 0)),
    )

    in_specs = [
        pl.BlockSpec((tile_m, d_model), lambda i, f: (i, 0)),
        pl.BlockSpec((d_model, tile_f), lambda i, f: (0, f)),
        pl.BlockSpec((1, tile_f), lambda i, f: (0, f)),
        pl.BlockSpec((tile_f, d_model), lambda i, f: (f, 0)),
        pl.BlockSpec((1, d_model), lambda i, f: (0, 0)),
    ]
    args = [x2d, w1, b1, w2, b2]
    if fuse_norm:
        in_specs += [pl.BlockSpec((1, d_model), lambda i, f: (0, 0)),
                     pl.BlockSpec((1, d_model), lambda i, f: (0, 0))]
        args += [norm_alpha, norm_bias]

    out2d = pl.pallas_call(
        functools.partial(ffn_kernel, fuse_norm=fuse_norm, eps=eps,
                          compute_dtype=compute_dtype),
        out_shape=jax.ShapeDtypeStruct((Mp, d_model), compute_dtype),
        grid_spec=pltpu.PrefetchScalarGridSpec(
            num_scalar_prefetch=0,
            grid=(n_i, nf),
            in_specs=in_specs,
            out_specs=pl.BlockSpec((tile_m, d_model), lambda i, f: (i, 0)),
            scratch_shapes=[pltpu.VMEM((tile_m, d_model), jnp.float32)],
        ),
        compiler_params=pltpu.CompilerParams(
            dimension_semantics=("parallel", "arbitrary"),
            vmem_limit_bytes=vmem_limit,
        ),
        cost_estimate=cost,
    )(*args)

    return out2d[:M].reshape(batch, seq, d_model)


# ---------------------------------------------------------------------------
# Standalone LayerNormalization (per the spec's forward, made runnable)
# ---------------------------------------------------------------------------
def layer_norm_kernel(x_ref, alpha_ref, bias_ref, o_ref, *, eps):
    x = x_ref[...].astype(jnp.float32)
    d = x.shape[-1]
    m = jnp.min(x, axis=-1, keepdims=True)          # spec literally uses x.min(dim=-1)
    mu = jnp.mean(x, axis=-1, keepdims=True)
    var = jnp.sum((x - mu) ** 2, axis=-1, keepdims=True) / (d - 1)  # torch.std (unbiased)
    inv = pl.reciprocal(jnp.sqrt(var) + eps, approx=True)           # EUP slot
    # TODO(synk): the spec's `alpha @ (...)` matmul is shape-invalid for
    # (batch, seq, features); implemented as the elementwise LayerNorm scale.
    o_ref[...] = (alpha_ref[...].astype(jnp.float32) * (x - m) * inv
                  + bias_ref[...].astype(jnp.float32)).astype(o_ref.dtype)


def layer_normalization(x, alpha, bias, *, eps=1e-6, tile_m=512):
    batch, seq, d_model = x.shape
    M = batch * seq
    x2d = x.reshape(M, d_model)
    tile_m = _pick_tile_m(M, tile_m)
    Mp = _round_up(M, tile_m)
    if Mp != M:
        x2d = jnp.pad(x2d, ((0, Mp - M), (0, 0)))

    out2d = pl.pallas_call(
        functools.partial(layer_norm_kernel, eps=eps),
        out_shape=jax.ShapeDtypeStruct((Mp, d_model), x.dtype),
        grid_spec=pltpu.PrefetchScalarGridSpec(
            num_scalar_prefetch=0,
            grid=(Mp // tile_m,),
            in_specs=[
                pl.BlockSpec((tile_m, d_model), lambda i: (i, 0)),
                pl.BlockSpec((1, d_model), lambda i: (0, 0)),
                pl.BlockSpec((1, d_model), lambda i: (0, 0)),
            ],
            out_specs=pl.BlockSpec((tile_m, d_model), lambda i: (i, 0)),
        ),
        compiler_params=pltpu.CompilerParams(
            dimension_semantics=("parallel",)),
    )(x2d, alpha, bias)

    return out2d[:M].reshape(batch, seq, d_model)


# ---------------------------------------------------------------------------
# Decoder forward: for layer in layers: x = layer(x, ...); return norm(x)
# (LayerNormalization fused into the last layer's finalize step.)
# ---------------------------------------------------------------------------
def decoder_forward(x, encoder_output, src_mask, tgt_mask, layer_params,
                    alpha, ln_bias, *, eps=1e-6):
    # TODO(synk): the spec's per-layer modules (self/cross-attention blocks) are
    # supplied externally and not defined in model.py; each layer here is the
    # feed-forward block, so encoder_output/src_mask/tgt_mask are unused.
    del encoder_output, src_mask, tgt_mask
    x = x.astype(jnp.bfloat16)            # bf16 activations end-to-end
    n = len(layer_params)
    if n == 0:
        return layer_normalization(x, alpha, ln_bias, eps=eps)
    for li, (w1, b1, w2, b2) in enumerate(layer_params):
        last = li == n - 1
        x = feed_forward_block(
            x, w1, b1, w2, b2,
            norm_alpha=alpha if last else None,
            norm_bias=ln_bias if last else None,
            eps=eps)
    return x


# ---------------------------------------------------------------------------
# Param init (mirrors torch.nn.Linear default U(-1/sqrt(fan_in), 1/sqrt(fan_in)))
# ---------------------------------------------------------------------------
def init_ffn_params(key, d_model, d_ff, *, weight_dtype=jnp.bfloat16):
    k1, k2, k3, k4 = jax.random.split(key, 4)
    bound1 = 1.0 / math.sqrt(d_model)
    bound2 = 1.0 / math.sqrt(d_ff)
    # stored transposed vs. PyTorch: (in_features, out_features)
    w1 = jax.random.uniform(k1, (d_model, d_ff), jnp.float32, -bound1, bound1
                            ).astype(weight_dtype)
    b1 = jax.random.uniform(k2, (1, d_ff), jnp.float32, -bound1, bound1)
    w2 = jax.random.uniform(k3, (d_ff, d_model), jnp.float32, -bound2, bound2
                            ).astype(weight_dtype)
    b2 = jax.random.uniform(k4, (1, d_model), jnp.float32, -bound2, bound2)
    return w1, b1, w2, b2


# ---------------------------------------------------------------------------
# Pure-JAX references (same bf16 casts / f32 accumulation as the kernels)
# ---------------------------------------------------------------------------
def _norm_ref(x2d, alpha, bias, eps):
    x = x2d.astype(jnp.float32)
    m = jnp.min(x, axis=-1, keepdims=True)
    mu = jnp.mean(x, axis=-1, keepdims=True)
    var = jnp.sum((x - mu) ** 2, axis=-1, keepdims=True) / (x.shape[-1] - 1)
    std = jnp.sqrt(var)
    return alpha * (x - m) / (std + eps) + bias


def _ffn_ref(x2d, w1, b1, w2, b2, norm=None, eps=1e-6,
             compute_dtype=jnp.bfloat16):
    xb = x2d.astype(compute_dtype)
    h = jnp.maximum(jnp.dot(xb, w1, preferred_element_type=jnp.float32) + b1, 0.0)
    y = jnp.dot(h.astype(compute_dtype), w2,
                preferred_element_type=jnp.float32) + b2
    if norm is not None:
        alpha, bias = norm
        y = _norm_ref(y, alpha, bias, eps)
    return y.astype(compute_dtype)


if __name__ == "__main__":
    key = jax.random.PRNGKey(0)
    k_x, k_enc, k_p = jax.random.split(key, 3)

    # Small but lane-dense shapes: d_model mult of 128, M = batch*seq = 32 gives
    # two 16-row token tiles so both v7x TensorCores get work on the parallel axis.
    batch, seq, d_model, d_ff, n_layers = 2, 16, 128, 512, 2
    eps = 1e-6

    x = jax.random.normal(k_x, (batch, seq, d_model), dtype=jnp.float32)
    encoder_output = jax.random.normal(k_enc, (batch, seq, d_model), dtype=jnp.float32)
    src_mask = None
    tgt_mask = None

    layer_keys = jax.random.split(k_p, n_layers)
    layer_params = [init_ffn_params(k, d_model, d_ff) for k in layer_keys]
    alpha = jnp.ones((1, d_model), jnp.float32)      # LayerNormalization: ones / zeros
    ln_bias = jnp.zeros((1, d_model), jnp.float32)

    out = decoder_forward(x, encoder_output, src_mask, tgt_mask,
                          layer_params, alpha, ln_bias, eps=eps)
    out = jax.block_until_ready(out)

    # Reference check (pure JAX, identical bf16 activation chain + fused LN).
    ref2d = x.reshape(-1, d_model).astype(jnp.bfloat16)
    for li, (w1, b1, w2, b2) in enumerate(layer_params):
        norm = (alpha, ln_bias) if li == n_layers - 1 else None
        ref2d = _ffn_ref(ref2d, w1, b1, w2, b2, norm=norm, eps=eps)
    ref = ref2d.reshape(batch, seq, d_model)

    assert out.shape == (batch, seq, d_model)
    err = float(jnp.max(jnp.abs(out.astype(jnp.float32) - ref.astype(jnp.float32))))
    assert err < 1e-1, err

    # Also exercise the standalone LayerNormalization kernel.
    ln_out = jax.block_until_ready(layer_normalization(x, alpha, ln_bias, eps=eps))
    ln_ref = _norm_ref(x.reshape(-1, d_model), alpha, ln_bias, eps
                       ).reshape(batch, seq, d_model)
    ln_err = float(jnp.max(jnp.abs(ln_out - ln_ref)))
    assert ln_err < 5e-2, ln_err

    print("KERNEL_OK")
</pallas_src>

<mosaic_0001>
module attributes {stable_mosaic.version = 11 : i64} {
  func.func @ffn_kernel(%arg0: i32, %arg1: i32, %arg2: memref<16x128xbf16, #tpu.memory_space<vmem>>, %arg3: memref<128x512xbf16, #tpu.memory_space<vmem>>, %arg4: memref<1x512xf32, #tpu.memory_space<vmem>>, %arg5: memref<512x128xbf16, #tpu.memory_space<vmem>>, %arg6: memref<1x128xf32, #tpu.memory_space<vmem>>, %arg7: memref<16x128xbf16, #tpu.memory_space<vmem>>, %arg8: memref<16x128xf32, #tpu.memory_space<vmem>>) attributes {dimension_semantics = [#tpu.dimension_semantics<parallel>, #tpu.dimension_semantics<arbitrary>], iteration_bounds = array<i64: 2, 1>, scalar_prefetch = 0 : i64, scratch_operands = 1 : i64, tpu.core_type = #tpu.core_type<tc>, window_params = [{transform_indices = @transform_0, window_bounds = array<i64: 16, 128>}, {transform_indices = @transform_1, window_bounds = array<i64: 128, 512>}, {transform_indices = @transform_2, window_bounds = array<i64: 1, 512>}, {transform_indices = @transform_3, window_bounds = array<i64: 512, 128>}, {pipeline_mode = #tpu.pipeline_mode<synchronous>, transform_indices = @transform_4, window_bounds = array<i64: 1, 128>}, {transform_indices = @transform_5, window_bounds = array<i64: 16, 128>}]} {
    %c0_i32 = arith.constant 0 : i32
    %0 = arith.cmpi eq, %arg1, %c0_i32 : i32
    %1 = arith.extui %0 : i1 to i32
    %c0_i32_0 = arith.constant 0 : i32
    %2 = arith.cmpi ne, %1, %c0_i32_0 : i32
    scf.if %2 {
      %cst_16 = arith.constant 0.000000e+00 : f32
      %20 = vector.broadcast %cst_16 : f32 to vector<16x128xf32>
      %c0_17 = arith.constant 0 : index
      %c0_18 = arith.constant 0 : index
      %21 = vector.load %arg8[%c0_17, %c0_18] : memref<16x128xf32, #tpu.memory_space<vmem>>, vector<16x128xf32>
      tpu.vector_store %arg8[%c0_17, %c0_18], %20 {strides = array<i32>} : memref<16x128xf32, #tpu.memory_space<vmem>>, vector<16x128xf32>,
    } else {
    }
    %c0 = arith.constant 0 : index
    %c0_1 = arith.constant 0 : index
    %3 = vector.load %arg2[%c0, %c0_1] : memref<16x128xbf16, #tpu.memory_space<vmem>>, vector<16x128xbf16>
    %c0_2 = arith.constant 0 : index
    %c0_3 = arith.constant 0 : index
    %4 = vector.load %arg3[%c0_2, %c0_3] : memref<128x512xbf16, #tpu.memory_space<vmem>>, vector<128x512xbf16>
    %cst = arith.constant dense<0.000000e+00> : vector<16x512xf32>
    %5 = tpu.matmul %3, %4, %cst {dimension_numbers = #tpu.dot_dimension_numbers<[1], [0], [0], [1], [0, 0, 1, 1], [], []>} : vector<16x128xbf16>, vector<128x512xbf16>, vector<16x512xf32> -> vector<16x512xf32>
    %c0_4 = arith.constant 0 : index
    %c0_5 = arith.constant 0 : index
    %6 = vector.load %arg4[%c0_4, %c0_5] : memref<1x512xf32, #tpu.memory_space<vmem>>, vector<1x512xf32>
    %7 = vector.broadcast %6 : vector<1x512xf32> to vector<16x512xf32>
    %8 = arith.addf %5, %7 : vector<16x512xf32>
    %cst_6 = arith.constant 0.000000e+00 : f32
    %9 = vector.broadcast %cst_6 : f32 to vector<16x512xf32>
    %10 = arith.maximumf %8, %9 : vector<16x512xf32>
    %c0_7 = arith.constant 0 : index
    %c0_8 = arith.constant 0 : index
    %11 = vector.load %arg8[%c0_7, %c0_8] : memref<16x128xf32, #tpu.memory_space<vmem>>, vector<16x128xf32>
    %12 = arith.truncf %10 : vector<16x512xf32> to vector<16x512xbf16>
    %c0_9 = arith.constant 0 : index
    %c0_10 = arith.constant 0 : index
    %13 = vector.load %arg5[%c0_9, %c0_10] : memref<512x128xbf16, #tpu.memory_space<vmem>>, vector<512x128xbf16>
    %cst_11 = arith.constant dense<0.000000e+00> : vector<16x128xf32>
    %14 = tpu.matmul %12, %13, %cst_11 {dimension_numbers = #tpu.dot_dimension_numbers<[1], [0], [0], [1], [0, 0, 1, 1], [], []>} : vector<16x512xbf16>, vector<512x128xbf16>, vector<16x128xf32> -> vector<16x128xf32>
    %15 = arith.addf %11, %14 : vector<16x128xf32>
    %c0_12 = arith.constant 0 : index
    %c0_13 = arith.constant 0 : index
    %16 = vector.load %arg8[%c0_12, %c0_13] : memref<16x128xf32, #tpu.memory_space<vmem>>, vector<16x128xf32>
    tpu.vector_store %arg8[%c0_12, %c0_13], %15 {strides = array<i32>} : memref<16x128xf32, #tpu.memory_space<vmem>>, vector<16x128xf32>,
    %c0_i32_14 = arith.constant 0 : i32
    %17 = arith.cmpi eq, %arg1, %c0_i32_14 : i32
    %18 = arith.extui %17 : i1 to i32
    %c0_i32_15 = arith.constant 0 : i32
    %19 = arith.cmpi ne, %18, %c0_i32_15 : i32
    scf.if %19 {
      %c0_16 = arith.constant 0 : index
      %c0_17 = arith.constant 0 : index
      %20 = vector.load %arg8[%c0_16, %c0_17] : memref<16x128xf32, #tpu.memory_space<vmem>>, vector<16x128xf32>
      %c0_18 = arith.constant 0 : index
      %c0_19 = arith.constant 0 : index
      %21 = vector.load %arg6[%c0_18, %c0_19] : memref<1x128xf32, #tpu.memory_space<vmem>>, vector<1x128xf32>
      %22 = vector.broadcast %21 : vector<1x128xf32> to vector<16x128xf32>
      %23 = arith.addf %20, %22 : vector<16x128xf32>
      %24 = arith.truncf %23 : vector<16x128xf32> to vector<16x128xbf16>
      %c0_20 = arith.constant 0 : index
      %c0_21 = arith.constant 0 : index
      %25 = vector.load %arg7[%c0_20, %c0_21] : memref<16x128xbf16, #tpu.memory_space<vmem>>, vector<16x128xbf16>
      tpu.vector_store %arg7[%c0_20, %c0_21], %24 {strides = array<i32>} : memref<16x128xbf16, #tpu.memory_space<vmem>>, vector<16x128xbf16>,
    } else {
    }
    return
  }
  func.func @transform_0(%arg0: i32, %arg1: i32) -> (i32, i32) {
    %c0_i32 = arith.constant 0 : i32
    %c0_i32_0 = arith.constant 0 : i32
    return %arg0, %c0_i32 : i32, i32
  }
  func.func @transform_1(%arg0: i32, %arg1: i32) -> (i32, i32) {
    %c0_i32 = arith.constant 0 : i32
    %c0_i32_0 = arith.constant 0 : i32
    return %c0_i32, %arg1 : i32, i32
  }
  func.func @transform_2(%arg0: i32, %arg1: i32) -> (i32, i32) {
    %c0_i32 = arith.constant 0 : i32
    %c0_i32_0 = arith.constant 0 : i32
    return %c0_i32, %arg1 : i32, i32
  }
  func.func @transform_3(%arg0: i32, %arg1: i32) -> (i32, i32) {
    %c0_i32 = arith.constant 0 : i32
    %c0_i32_0 = arith.constant 0 : i32
    return %arg1, %c0_i32 : i32, i32
  }
  func.func @transform_4(%arg0: i32, %arg1: i32) -> (i32, i32) {
    %c0_i32 = arith.constant 0 : i32
    %c0_i32_0 = arith.constant 0 : i32
    %c0_i32_1 = arith.constant 0 : i32
    return %c0_i32, %c0_i32_0 : i32, i32
  }
  func.func @transform_5(%arg0: i32, %arg1: i32) -> (i32, i32) {
    %c0_i32 = arith.constant 0 : i32
    %c0_i32_0 = arith.constant 0 : i32
    return %arg0, %c0_i32 : i32, i32
  }
}

</mosaic_0001>

<bundles_post_ra>
// kernel: tpu_custom_call.1
= control target key start
LH: loop header
LB: loop body
LE: loop exit
PB: predicated region body
PF: predicated region fallthrough
CT: control target
= control target key end

     0   :  { %10 = vsyncpa [#allocation4], 0  ;;  %s1949_s0 = inlined_call_operand.hbm [shape: bf16[32,128], index: 0, kind: input, shape index: {}]   ;;  %s1950_s1 = inlined_call_operand.hbm [shape: bf16[128,512], index: 1, kind: input, shape index: {}]   ;;  %s1951_s2 = inlined_call_operand.vmem [shape: f32[1,512], index: 2, kind: input, shape index: {}]   ;;  %s1952_s3 = inlined_call_operand.hbm [shape: bf16[512,128], index: 3, kind: input, shape index: {}]   ;;  %s1953_s4 = inlined_call_operand.vmem [shape: f32[1,128], index: 4, kind: input, shape index: {}]   ;;  %s1954_s5 = inlined_call_operand.hbm [shape: bf16[32,128], index: 5, kind: output, shape index: {}]  }
   0x1   :  { %12 = vsyncpa [#allocation4 + $0x1], 0 }
   0x2   :  { %13 = vsyncpa [#allocation7], 0 }
   0x3   :  { %14 = vsyncpa [#allocation5], 0 }
   0x4   :  { %16 = vsyncpa [#allocation5 + $0x1], 0  ;;  %s1675_s18 = smov 0   ;;  %s1677_s19 = smov 0  }
   0x5   :  { %s1679_s20 = smov 0   ;;  %s1681_s21 = smov 0  }
   0x6   :  { %s1683_s22 = smov 0   ;;  %s1685_s23 = smov 0  }
   0x7 LB: > { %s1148_s24 = sadd.s32 4294967295, %s1632_s23   ;;  %s1149_s25 = sadd.s32 4294967294, %s1632_s23   ;;  %s1632_s23 = sphi %s1685_s23, %s22_s23   ;;  %s1628_s22 = sphi %s1683_s22, %s1978_s22   ;;  %s1624_s21 = sphi %s1681_s21, %s1977_s21   ;;  %s1620_s20 = sphi %s1679_s20, %s1976_s20   ;;  %s1616_s19 = sphi %s1677_s19, %s1975_s19   ;;  %s1612_s18 = sphi %s1675_s18, %s1974_s18  }
   0x8   : > { %p54_p0 = scmp.ne.s32.totalorder %s1616_s19, %s1612_s18  ;;  %p1709_p1 = scmp.eq.s32.totalorder %s1148_s24, 0 }
   0x9   : > { %p1713_p2 = scmp.eq.s32.totalorder %s1148_s24, 1  ;;  %p183_p3 = scmp.eq.s32.totalorder %s1149_s25, 1 }
   0xa   : > { %s1960_s26 = scalar_select %p1709_p1, 1, 0 }
   0xb   : > { %p1719_p4 = por %p1709_p1, %p54_p0  ;;  %p1150_p5 = scmp.ge.s32.totalorder %s1632_s23, 1 }
   0xc   : > { %p1724_p6 = por %p183_p3, %p54_p0  ;;  %p190_p7 = scmp.lt.s32.totalorder %s1632_s23, 3 }
   0xd   : > { %s1962_s28 = scalar_select %p1719_p4, 1, 0 }
   0xe   : > { %s1963_s29 = scalar_select %p1724_p6, 1, 0 }
   0xf   : > { %p1729_p8 = pnand %p1150_p5, %p190_p7  ;;  %s1634_s6 = smov [#allocation6]  }
  0x10   : > { %s205_s7 = sshll.u32 %s1634_s6, 4  ;;  %s1635_s9 = smov [#allocation8]   ;;  %s1733_s7 = int_to_ptr.vmem [resolvable:$true] %s205_s7 }
  0x11   : > { %p1301_p9 = pneg %p1729_p8  ;;  %s229_s10 = sshll.u32 %s1635_s9, 4  ;;  %s1744_s10 = int_to_ptr.vmem [resolvable:$true] %s229_s10 }
  0x12   : > { %s1460_s13 = scalar_lea.hbm %s1950_s1, 4096 }
  0x13   : > { %p1740_p11 = pnand %p1301_p9, %p1709_p1  ;;  %p1461_p12 = scmp.ne.s32.totalorder %s1950_s1, %s1460_s13 }
  0x14   : > { %p1467_p5 = scmp.lt.u32.totalorder %s1460_s13, %s1950_s1 }
  0x15   : > { %p1462_p13 = pneg %p1740_p11 }
  0x17   : > { %p1463_p0 = pnand %p1462_p13, %p1461_p12 }
  0x19   : > { %p1464_p3 = pneg %p1463_p0 }
  0x1b   : > { %p1469_p7 = pnand %p1467_p5, %p1464_p3 }
  0x1d   : > { %1472 = shalt.err (!%p1469_p7)
}
  0x1e   : > { %s1473_s24 = scalar_lea.vmem %s1733_s7, 4096  ;;  %p1481_p1 = scmp.lt.s32.totalorder %s1733_s7, %s1733_s7 }
  0x1f   : > { %p1474_p9 = scmp.ne.s32.totalorder %s1733_s7, %s1473_s24  ;;  %p1482_p12 = scmp.lt.s32.totalorder %s1473_s24, %s1473_s24 }
  0x21   : > { %p1476_p10 = pnand %p1474_p9, %p1462_p13  ;;  %p1483_p0 = por %p1482_p12, %p1481_p1 }
  0x23   : > { %p1477_p6 = pneg %p1476_p10 }
  0x25   : > { %p1484_p4 = pnand %p1483_p0, %p1477_p6 }
  0x27   : > { %1487 = shalt.err (!%p1484_p4)
}
  0x28   : > { %s1636_s25 = smov 256   ;;  %s1637_s6 = smov 16  }
  0x29   : > { %1304 = dma.hbm_to_vmem [thread:$0]  (!%p1740_p11), %s1950_s1, 4096, %s1733_s7, [#allocation7], %s1636_s25, %s1636_s25, %s1637_s6  }
  0x2a   : > { %s1488_s14 = scalar_lea.hbm %s1952_s3, 4096 }
  0x2b   : > { %p1489_p1 = scmp.ne.s32.totalorder %s1952_s3, %s1488_s14  ;;  %p1495_p10 = scmp.lt.u32.totalorder %s1488_s14, %s1952_s3 }
  0x2d   : > { %p1491_p4 = pnand %p1489_p1, %p1462_p13 }
  0x2f   : > { %p1492_p6 = pneg %p1491_p4 }
  0x31   : > { %p1497_p3 = pnand %p1495_p10, %p1492_p6 }
  0x33   : > { %1500 = shalt.err (!%p1497_p3)
}
  0x34   : > { %s1501_s7 = scalar_lea.vmem %s1744_s10, 4096  ;;  %p1509_p12 = scmp.lt.s32.totalorder %s1744_s10, %s1744_s10 }
  0x35   : > { %p1502_p5 = scmp.ne.s32.totalorder %s1744_s10, %s1501_s7  ;;  %p1510_p0 = scmp.lt.s32.totalorder %s1501_s7, %s1501_s7 }
  0x37   : > { %p1504_p7 = pnand %p1502_p5, %p1462_p13  ;;  %p1511_p1 = por %p1510_p0, %p1509_p12 }
  0x39   : > { %p1505_p9 = pneg %p1504_p7 }
  0x3b   : > { %p1512_p4 = pnand %p1511_p1, %p1505_p9 }
  0x3d   : > { %1515 = shalt.err (!%p1512_p4)
}
  0x3e   : > { %s1958_s25 = smov 64   ;;  %s1639_s6 = smov 4  }
  0x3f   : > { %1307 = dma.hbm_to_vmem [thread:$0]  (!%p1740_p11), %s1952_s3, 4096, %s1744_s10, [#allocation7], %s1958_s25, %s1958_s25, %s1639_s6  }
  0x40   : > { %s34_s12 = sadd.s32 1, %s1628_s22  ;;  %s41_s13 = sadd.s32 1, %s1620_s20 }
  0x41   : > { %p36_p13 = scmp.ge.s32.totalorder %s34_s12, 2  ;;  %p48_p6 = scmp.ne.s32.totalorder %s1620_s20, %s1616_s19 }
  0x42   : > { %p49_p10 = scmp.eq.s32.totalorder %s1632_s23, 0  ;;  %p1318_p3 = scmp.lt.s32.totalorder %s1632_s23, 2 }
  0x43   : > { %s1980_s12 = smov (%p36_p13, %s34_s12), 0  ;;  %p1811_p7 = por %p1713_p2, %p48_p6 }
  0x44   : > { %p50_p5 = por %p49_p10, %p48_p6  ;;  %s38_s14 = ssub.s32 %s1628_s22, %s1980_s12 }
  0x45   : > { %s1966_s8 = scalar_select %p1811_p7, 1, 0 }
  0x46   : > { %s246_s15 = sand.u32 1, %s1620_s20   ;;  %p39_p9 = scmp.eq.s32.totalorder %s38_s14, 0 }
  0x47   : > { %s1155_s10 = sshll.u32 %s246_s15, 3  ;;  %s1236_s16 = sshll.u32 %s1628_s22, 7 }
  0x48   : > { %s1820_s17 = scalar_select %p39_p9, %s1620_s20, %s41_s13  }
  0x49   : > { %s1825_s9 = scalar_lea.hbm %s1949_s0, %s1236_s16  ;;  %s250_s27 = scalar_lea.vmem [#allocation3], %s1155_s10 }
  0x4a   : > { %s257_s11 = sshll.u32 %s250_s27, 4  ;;  %p1829_p2 = pnand %p1318_p3, %p50_p5  ;;  %s1833_s11 = int_to_ptr.vmem [resolvable:$true] %s257_s11 }
  0x4b   : > { %s1835_s13 = scalar_lea.sflag [#allocation4], %s246_s15  ;;  %s1516_s14 = scalar_lea.hbm %s1825_s9, 128 }
  0x4c   : > { %p1517_p11 = scmp.ne.s32.totalorder %s1825_s9, %s1516_s14  ;;  %p1518_p12 = pneg %p1829_p2 }
  0x4d   : > { %s1521_s24 = scalar_lea.hbm %s1949_s0, 256  ;;  %p1522_p4 = scmp.lt.u32.totalorder %s1825_s9, %s1949_s0 }
  0x4e   : > { %p1519_p0 = pnand %p1518_p12, %p1517_p11  ;;  %p1523_p13 = scmp.lt.u32.totalorder %s1521_s24, %s1516_s14 }
  0x4f   : > { %p1525_p10 = scmp.lt.u32.totalorder %s1516_s14, %s1825_s9 }
  0x50   : > { %p1520_p1 = pneg %p1519_p0  ;;  %p1524_p6 = por %p1523_p13, %p1522_p4 }
  0x52   : > { %p1526_p3 = por %p1525_p10, %p1524_p6 }
  0x54   : > { %p1527_p5 = pnand %p1526_p3, %p1520_p1 }
  0x56   : > { %1530 = shalt.err (!%p1527_p5)
}
  0x57   : > { %s1531_s15 = scalar_lea.vmem %s1833_s11, 128  ;;  %s1640_s10 = smov [#allocation3]  }
  0x58   : > { %p1532_p9 = scmp.ne.s32.totalorder %s1833_s11, %s1531_s15  ;;  %s1536_s16 = sshll.u32 %s1640_s10, 4  ;;  %s1537_s16 = int_to_ptr.vmem [resolvable:$false] %s1536_s16 }
  0x59   : > { %s1538_s7 = scalar_lea.vmem %s1537_s16, 256  ;;  %p1539_p7 = scmp.lt.s32.totalorder %s1833_s11, %s1537_s16 }
  0x5a   : > { %p1534_p11 = pnand %p1532_p9, %p1518_p12  ;;  %p1540_p4 = scmp.lt.s32.totalorder %s1538_s7, %s1531_s15 }
  0x5c   : > { %p1535_p0 = pneg %p1534_p11  ;;  %p1541_p13 = por %p1540_p4, %p1539_p7 }
  0x5e   : > { %p1542_p6 = pnand %p1541_p13, %p1535_p0 }
  0x60   : > { %1545 = shalt.err (!%p1542_p6)
}
  0x61   : > { %s1968_s14 = smov 64   ;;  %269 = sbr.rel (%p1729_p8) target bundleno = 602 (0x25a), region = 40 }
  0x62   : > { %1311 = dma.hbm_to_vmem [thread:$0]  (!%p1829_p2), %s1825_s9, 128, %s1833_s11, %s1835_s13, %s1968_s14, %s1968_s14, %s1639_s6  }
  0x63   : > { %s1869_s24 = sand.u32 (!%p1729_p8), 1, %s1616_s19   ;;  %p1969_p7 = scmp.ne.s32.totalorder (!%p1729_p8), %s1962_s28, 0 }
  0x64   : > { %s1159_s27 = sshll.u32 (!%p1729_p8), %s1869_s24, 3  ;;  %s272_s15 = scalar_lea.sflag (!%p1729_p8), [#allocation4], %s1869_s24 }
  0x65   : > { %s1875_s25 = scalar_lea.vmem (!%p1729_p8), [#allocation3], %s1159_s27 }
  0x68   : > { %1599 = dma.done.wait (%p1969_p7), %s272_s15, 128  }
  0x69   : > { %1601 = vsyncadd (%p1969_p7), %s272_s15, 4294967168  ;;  %p1970_p2 = scmp.ne.s32.totalorder %s1960_s26, 0 }
  0x6b   : > { %1603 = dma.done.wait (%p1970_p2), [#allocation7], 8192  }
  0x6c   : > { %1605 = vsyncadd (%p1970_p2), [#allocation7], 4294959104  ;;  %v1641_v0 = vmov 0   ;;  %v1379_v1 = vld [vmem:[#allocation6 + $0x4] ss:$16 sps:$4 sm:$0xff]   ;;  %v1432_v38 = vld [vmem:[#allocation8 + $0x48] sm:$0xff]  }
  0x6d   : > { %584 = vmatprep.mubr.bf16.mxu0 %v1641_v0  ;;  %627 = vmatprep.mubr.bf16.mxu1 %v1641_v0  ;;  %v1381_v2 = vld [vmem:[#allocation6 + $0xc] ss:$16 sps:$4 sm:$0xff]   ;;  %v1383_v3 = vld [vmem:[#allocation6] ss:$16 sps:$4 sm:$0xff]   ;;  %v1384_v4 = vld [vmem:[#allocation6 + $0x8] ss:$16 sps:$4 sm:$0xff]  }
  0x6e   : > { %552 = vmatprep.subr.bf16.mxu0 %v1379_v1  ;;  %595 = vmatprep.subr.bf16.mxu1 %v1381_v2  ;;  %v1385_v5 = vld [vmem:[#allocation6 + $0x24] ss:$16 sps:$4 sm:$0xff]   ;;  %v1387_v6 = vld [vmem:[#allocation6 + $0x2c] ss:$16 sps:$4 sm:$0xff]   ;;  %v1389_v7 = vld [vmem:[#allocation6 + $0x20] ss:$16 sps:$4 sm:$0xff]   ;;  %v366_v2 = vlaneseq }
  0x6f   : > { %553 = vmatpush1.bf16.msra.mxu0 %v1383_v3  ;;  %596 = vmatpush1.bf16.msra.mxu1 %v1384_v4  ;;  %v1390_v8 = vld [vmem:[#allocation6 + $0x28] ss:$16 sps:$4 sm:$0xff]   ;;  %v1391_v9 = vld [vmem:[#allocation6 + $0x44] ss:$16 sps:$4 sm:$0xff]   ;;  %v1393_v10 = vld [vmem:[#allocation6 + $0x4c] ss:$16 sps:$4 sm:$0xff]  }
  0x70   : > { %554 = vmatprep.subr.bf16.mxu0 %v1385_v5  ;;  %597 = vmatprep.subr.bf16.mxu1 %v1387_v6  ;;  %v1395_v11 = vld [vmem:[#allocation6 + $0x40] ss:$16 sps:$4 sm:$0xff]   ;;  %v1396_v12 = vld [vmem:[#allocation6 + $0x48] ss:$16 sps:$4 sm:$0xff]   ;;  %v1397_v13 = vld [vmem:[#allocation6 + $0x64] ss:$16 sps:$4 sm:$0xff]  }
  0x71   : > { %v1399_v14 = vld [vmem:[#allocation6 + $0x6c] ss:$16 sps:$4 sm:$0xff]   ;;  %v1401_v15 = vld [vmem:[#allocation6 + $0x60] ss:$16 sps:$4 sm:$0xff]   ;;  %v1402_v16 = vld [vmem:[#allocation6 + $0x68] ss:$16 sps:$4 sm:$0xff]  }
  0x72   : > { %v1403_v17 = vld [vmem:[#allocation6 + $0x84] ss:$16 sps:$4 sm:$0xff]   ;;  %v1405_v18 = vld [vmem:[#allocation6 + $0x8c] ss:$16 sps:$4 sm:$0xff]   ;;  %v1407_v19 = vld [vmem:[#allocation6 + $0x80] ss:$16 sps:$4 sm:$0xff]  }
  0x73   : > { %555 = vmatpush1.bf16.msra.mxu0 %v1389_v7  ;;  %598 = vmatpush1.bf16.msra.mxu1 %v1390_v8  ;;  %v1408_v20 = vld [vmem:[#allocation6 + $0x88] ss:$16 sps:$4 sm:$0xff]   ;;  %v1409_v21 = vld [vmem:[#allocation6 + $0xa4] ss:$16 sps:$4 sm:$0xff]   ;;  %v1411_v22 = vld [vmem:[#allocation6 + $0xac] ss:$16 sps:$4 sm:$0xff]  }
  0x74   : > { %556 = vmatprep.subr.bf16.mxu0 %v1391_v9  ;;  %599 = vmatprep.subr.bf16.mxu1 %v1393_v10  ;;  %v1413_v23 = vld [vmem:[#allocation6 + $0xa0] ss:$16 sps:$4 sm:$0xff]   ;;  %v1414_v24 = vld [vmem:[#allocation6 + $0xa8] ss:$16 sps:$4 sm:$0xff]   ;;  %v1415_v25 = vld [vmem:[#allocation6 + $0xc4] ss:$16 sps:$4 sm:$0xff]  }
  0x75   : > { %v1417_v26 = vld [vmem:[#allocation6 + $0xcc] ss:$16 sps:$4 sm:$0xff]   ;;  %v1419_v27 = vld [vmem:[#allocation6 + $0xc0] ss:$16 sps:$4 sm:$0xff]   ;;  %v1420_v28 = vld [vmem:[#allocation6 + $0xc8] ss:$16 sps:$4 sm:$0xff]  }
  0x76   : > { %v1421_v29 = vld [vmem:[#allocation6 + $0xe4] ss:$16 sps:$4 sm:$0xff]   ;;  %v1423_v30 = vld [vmem:[#allocation6 + $0xec] ss:$16 sps:$4 sm:$0xff]   ;;  %v1425_v31 = vld [vmem:[#allocation6 + $0xe0] ss:$16 sps:$4 sm:$0xff]  }
  0x77   : > { %557 = vmatpush1.bf16.msra.mxu0 %v1395_v11  ;;  %600 = vmatpush1.bf16.msra.mxu1 %v1396_v12  ;;  %v1426_v32 = vld [vmem:[#allocation6 + $0xe8] ss:$16 sps:$4 sm:$0xff]   ;;  %v1428_v33 = vld [vmem:[#allocation8 + $0x40] sm:$0xff]   ;;  %v1436_v42 = vld [vmem:[#allocation8 + $0x50] sm:$0xff]   ;;  %v367_v3 = vshrl.u32 %v366_v2, 7  ;;  %s1239_s9 = sshll.u32 %s1624_s21, 7 }
  0x78   : > { %558 = vmatprep.subr.bf16.mxu0 %v1397_v13  ;;  %601 = vmatprep.subr.bf16.mxu1 %v1399_v14  ;;  %v1427_v34 = vld [vmem:[%s1875_s25] sm:$0xff]   ;;  %v1429_v35 = vld [vmem:[#allocation8 + $0xc0] sm:$0xff]   ;;  %v1433_v39 = vld [vmem:[#allocation8 + $0xc8] sm:$0xff]   ;;  %s313_s11 = scalar_lea.vmem [#allocation9], %s1159_s27  ;;  %s1898_s7 = scalar_lea.hbm %s1954_s5, %s1239_s9 }
  0x79   : > { %v1430_v36 = vld [vmem:[#allocation8] sm:$0xff]   ;;  %v1434_v40 = vld [vmem:[#allocation8 + $0x8] sm:$0xff]   ;;  %v1437_v43 = vld [vmem:[#allocation8 + $0xd0] sm:$0xff]   ;;  %v368_v4 = vsub.s32 0, %v367_v3  ;;  %v376_v5 = vsub.s32 2, %v367_v3  ;;  %v372_v7 = vsub.s32 1, %v367_v3 }
  0x7a   : > { %v1431_v37 = vld [vmem:[#allocation8 + $0x80] sm:$0xff]   ;;  %v1435_v41 = vld [vmem:[#allocation8 + $0x88] sm:$0xff]   ;;  %v1438_v44 = vld [vmem:[#allocation8 + $0x10] sm:$0xff]   ;;  %v380_v8 = vsub.s32 3, %v367_v3  ;;  %s1032_s13 = sshll.u32 %s313_s11, 4  ;;  %s1019_s14 = scalar_lea.sflag [#allocation5], %s1869_s24  ;;  %s1900_s13 = int_to_ptr.vmem [resolvable:$true] %s1032_s13 }
  0x7b   : > { %559 = vmatpush1.bf16.msra.mxu0 %v1401_v15  ;;  %602 = vmatpush1.bf16.msra.mxu1 %v1402_v16  ;;  %v1439_v45 = vld [vmem:[#allocation8 + $0x90] sm:$0xff]   ;;  %v1440_v46 = vld [vmem:[#allocation8 + $0x58] sm:$0xff]   ;;  %v1444_v50 = vld [vmem:[#allocation8 + $0x60] sm:$0xff]   ;;  %s1546_s15 = scalar_lea.vmem %s1900_s13, 128  ;;  %p1971_p12 = scmp.ne.s32.totalorder %s1966_s8, 0 }
  0x7c   : > { %560 = vmatprep.subr.bf16.mxu0 %v1403_v17  ;;  %603 = vmatprep.subr.bf16.mxu1 %v1405_v18  ;;  %v1441_v47 = vld [vmem:[#allocation8 + $0xd8] sm:$0xff]   ;;  %v1445_v51 = vld [vmem:[#allocation8 + $0xe0] sm:$0xff]   ;;  %v1448_v54 = vld [vmem:[#allocation8 + $0x68] sm:$0xff]   ;;  %p1547_p8 = scmp.ne.s32.totalorder %s1900_s13, %s1546_s15  ;;  %s1642_s21 = smov [#allocation9]  }
  0x7d   : > { %v1442_v48 = vld [vmem:[#allocation8 + $0x18] sm:$0xff]   ;;  %v1446_v52 = vld [vmem:[#allocation8 + $0x20] sm:$0xff]   ;;  %v1449_v55 = vld [vmem:[#allocation8 + $0xe8] sm:$0xff]   ;;  %s1550_s27 = sshll.u32 %s1642_s21, 4  ;;  %s1551_s27 = int_to_ptr.vmem [resolvable:$false] %s1550_s27 }
  0x7e   : > { %v1443_v49 = vld [vmem:[#allocation8 + $0x98] sm:$0xff]   ;;  %v1447_v53 = vld [vmem:[#allocation8 + $0xa0] sm:$0xff]   ;;  %v1450_v56 = vld [vmem:[#allocation8 + $0x28] sm:$0xff]   ;;  %p1548_p1 = pnand %p1547_p8, %p1971_p12  ;;  %s1552_s25 = scalar_lea.vmem %s1551_s27, 256 }
  0x7f   : > { %561 = vmatpush1.bf16.msra.mxu0 %v1407_v19  ;;  %604 = vmatpush1.bf16.msra.mxu1 %v1408_v20  ;;  %v1451_v57 = vld [vmem:[#allocation8 + $0xa8] sm:$0xff]   ;;  %v1452_v58 = vld [vmem:[#allocation8 + $0x70] sm:$0xff]   ;;  %v1456_v62 = vld [vmem:[#allocation8 + $0x78] sm:$0xff]   ;;  %p1553_p3 = scmp.lt.s32.totalorder %s1900_s13, %s1551_s27  ;;  %p1554_p5 = scmp.lt.s32.totalorder %s1552_s25, %s1546_s15 }
  0x80   : > { %562 = vmatprep.subr.bf16.mxu0 %v1409_v21  ;;  %605 = vmatprep.subr.bf16.mxu1 %v1411_v22  ;;  %v1453_v59 = vld [vmem:[#allocation8 + $0xf0] sm:$0xff]   ;;  %v1457_v63 = vld [vmem:[#allocation8 + $0xf8] sm:$0xff]   ;;  %p1549_p10 = pneg %p1548_p1 }
  0x81   : > { %v1454_v60 = vld [vmem:[#allocation8 + $0x30] sm:$0xff]   ;;  %v1458_v0 = vld [vmem:[#allocation8 + $0x38] sm:$0xff]   ;;  %p1555_p9 = por %p1554_p5, %p1553_p3 }
  0x82   : > { %v1455_v61 = vld [vmem:[#allocation8 + $0xb0] sm:$0xff]   ;;  %v1459_v1 = vld [vmem:[#allocation8 + $0xb8] sm:$0xff]  }
  0x83   : > { %563 = vmatpush1.bf16.msra.mxu0 %v1413_v23  ;;  %606 = vmatpush1.bf16.msra.mxu1 %v1414_v24  ;;  %v364_v6 = vld [vmem:[%s1951_s2] sm:$0xf]  ;;  %p1556_p11 = pnand %p1555_p9, %p1549_p10 }
  0x84   : > { %564 = vmatprep.subr.bf16.mxu0 %v1415_v25  ;;  %607 = vmatprep.subr.bf16.mxu1 %v1417_v26  ;;  %v369_v9 = vrot.slane %v364_v6, %v368_v4  ;;  %v377_v10 = vrot.slane %v364_v6, %v376_v5  ;;  %v373_v11 = vrot.slane %v364_v6, %v372_v7 }
  0x85   : > { %v381_v12 = vrot.slane %v364_v6, %v380_v8 }
  0x87   : > { %565 = vmatpush1.bf16.msra.mxu0 %v1419_v27  ;;  %608 = vmatpush1.bf16.msra.mxu1 %v1420_v28 }
  0x88   : > { %566 = vmatprep.subr.bf16.mxu0 %v1421_v29  ;;  %609 = vmatprep.subr.bf16.mxu1 %v1423_v30 }
  0x8b   : > { %567 = vmatpush1.bf16.msra.mxu0 %v1425_v31  ;;  %610 = vmatpush1.bf16.msra.mxu1 %v1426_v32 }
  0x8c   : > { %1245 = vmatprep.subr.bf16.mxu0 %v1428_v33  ;;  %1267 = vmatprep.subr.bf16.mxu1 %v1429_v35 }
  0x8e   : > { %585 = vmatmul.mubr.bf16.vlgmr.msra.gmra.mrb[0].mxu0 %v1427_v34  ;;  %628 = vmatmul.mubr.bf16.vlgmr.msra.gmra.mrb[0].mxu1 %v1427_v34 }
  0x8f   : > { %1246 = vmatpush3.bf16.msra.mxu0 %v1430_v36  ;;  %1268 = vmatpush3.bf16.msra.mxu1 %v1431_v37 }
  0x90   : > { %1247 = vmatprep.subr.bf16.mxu0 %v1432_v38  ;;  %1269 = vmatprep.subr.bf16.mxu1 %v1433_v39 }
  0x93   : > { %1248 = vmatpush3.bf16.msra.mxu0 %v1434_v40  ;;  %1270 = vmatpush3.bf16.msra.mxu1 %v1435_v41 }
  0x94   : > { %1249 = vmatprep.subr.bf16.mxu0 %v1436_v42  ;;  %1271 = vmatprep.subr.bf16.mxu1 %v1437_v43 }
  0x97   : > { %1250 = vmatpush3.bf16.msra.mxu0 %v1438_v44  ;;  %1272 = vmatpush3.bf16.msra.mxu1 %v1439_v45 }
  0x98   : > { %1251 = vmatprep.subr.bf16.mxu0 %v1440_v46  ;;  %1273 = vmatprep.subr.bf16.mxu1 %v1441_v47 }
  0x9b   : > { %1252 = vmatpush3.bf16.msra.mxu0 %v1442_v48  ;;  %1274 = vmatpush3.bf16.msra.mxu1 %v1443_v49 }
  0x9c   : > { %1253 = vmatprep.subr.bf16.mxu0 %v1444_v50  ;;  %1275 = vmatprep.subr.bf16.mxu1 %v1445_v51 }
  0x9f   : > { %1254 = vmatpush3.bf16.msra.mxu0 %v1446_v52  ;;  %1276 = vmatpush3.bf16.msra.mxu1 %v1447_v53 }
  0xa0   : > { %1255 = vmatprep.subr.bf16.mxu0 %v1448_v54  ;;  %1277 = vmatprep.subr.bf16.mxu1 %v1449_v55  ;;  %v1228_v54 = vld [vmem:[%s1953_s4] ss:$0 sm:$0xff] }
  0xa3   : > { %1256 = vmatpush3.bf16.msra.mxu0 %v1450_v56  ;;  %1278 = vmatpush3.bf16.msra.mxu1 %v1451_v57 }
  0xa4   : > { %1257 = vmatprep.subr.bf16.mxu0 %v1452_v58  ;;  %1279 = vmatprep.subr.bf16.mxu1 %v1453_v59 }
  0xa7   : > { %1258 = vmatpush3.bf16.msra.mxu0 %v1454_v60  ;;  %1280 = vmatpush3.bf16.msra.mxu1 %v1455_v61 }
  0xa8   : > { %1259 = vmatprep.subr.bf16.mxu0 %v1456_v62  ;;  %1281 = vmatprep.subr.bf16.mxu1 %v1457_v63 }
  0xab   : > { %1260 = vmatpush3.bf16.msra.mxu0 %v1458_v0  ;;  %1282 = vmatpush3.bf16.msra.mxu1 %v1459_v1 }
 0x161   : > { %v586_v13 = vpop.f32.mrb[0].mxu0  ;;  %v629_v14 = vpop.f32.mrb[0].mxu1 }
 0x162   : > { %v587_v15 = vadd.f32 %v586_v13, %v369_v9  ;;  %v630_v16 = vadd.f32 %v629_v14, %v377_v10  ;;  %v588_v17 = vpop.f32.mrb[1].mxu0  ;;  %v631_v18 = vpop.f32.mrb[1].mxu1 }
 0x163   : > { %v589_v19 = vadd.f32 %v588_v17, %v373_v11  ;;  %v632_v20 = vadd.f32 %v631_v18, %v381_v12  ;;  %v590_v21 = vpop.f32.mrb[2].mxu0  ;;  %v633_v22 = vpop.f32.mrb[2].mxu1 }
 0x164   : > { %v591_v23 = vadd.f32 %v590_v21, %v369_v9  ;;  %v634_v24 = vadd.f32 %v633_v22, %v377_v10  ;;  %v592_v25 = vpop.f32.mrb[3].mxu0  ;;  %v635_v26 = vpop.f32.mrb[3].mxu1  ;;  %v638_v29 = vmax.f32 %v587_v15, 0.0  ;;  %v640_v30 = vmax.f32 %v630_v16, 0.0 }
 0x165   : > { %v593_v27 = vadd.f32 %v592_v25, %v373_v11  ;;  %v636_v28 = vadd.f32 %v635_v26, %v381_v12  ;;  %v639_v33 = vmax.f32 %v589_v19, 0.0  ;;  %v641_v34 = vmax.f32 %v632_v20, 0.0 }
 0x166   : > { %v642_v31 = vmax.f32 %v591_v23, 0.0  ;;  %v644_v32 = vmax.f32 %v634_v24, 0.0 }
 0x167   : > { %v643_v35 = vmax.f32 %v593_v27, 0.0  ;;  %v645_v36 = vmax.f32 %v636_v28, 0.0 }
 0x168   : > { %v648_v37 = vpack.c.bf16 %v642_v31, %v638_v29  ;;  %v650_v38 = vpack.c.bf16 %v644_v32, %v640_v30 }
 0x169   : > { %v649_v39 = vpack.c.bf16 %v643_v35, %v639_v33  ;;  %v651_v40 = vpack.c.bf16 %v645_v36, %v641_v34 }
 0x16b   : > { %940 = vmatprep.mubr.bf16.mxu0 %v649_v39  ;;  %981 = vmatprep.mubr.bf16.mxu1 %v651_v40 }
 0x16c   : > { %941 = vmatmul.mubr.bf16.vlgmr.msra.gmra.mrb[4].mxu0 %v648_v37  ;;  %982 = vmatmul.mubr.bf16.vlgmr.msra.gmra.mrb[4].mxu1 %v650_v38 }
 0x23f   : > { %v1261_v41 = vpop.f32.mrb[4].mxu0  ;;  %v1283_v42 = vpop.f32.mrb[4].mxu1 }
 0x240   : > { %v1262_v43 = vpop.f32.mrb[5].mxu0  ;;  %v1284_v44 = vpop.f32.mrb[5].mxu1 }
 0x241   : > { %v1263_v45 = vadd.f32 %v1262_v43, %v1261_v41  ;;  %v1285_v46 = vadd.f32 %v1284_v44, %v1283_v42  ;;  %v1264_v47 = vpop.f32.mrb[6].mxu0  ;;  %v1286_v48 = vpop.f32.mrb[6].mxu1 }
 0x242   : > { %v1265_v49 = vpop.f32.mrb[7].mxu0  ;;  %v1287_v50 = vpop.f32.mrb[7].mxu1 }
 0x243   : > { %v984_v51 = vadd.f32 %v1285_v46, %v1263_v45  ;;  %v1266_v52 = vadd.f32 %v1265_v49, %v1264_v47  ;;  %v1288_v53 = vadd.f32 %v1287_v50, %v1286_v48 }
 0x245   : > { %v987_v55 = vadd.f32 %v1288_v53, %v1266_v52  ;;  %v1006_v56 = vadd.f32 %v1228_v54, %v984_v51 }
 0x247   : > { %v1007_v57 = vadd.f32 %v1228_v54, %v987_v55 }
 0x249   : > { %v1243_v58 = vpack.c.bf16 %v1007_v57, %v1006_v56 }
 0x24b   : > { %1244 = vst [vmem:[%s313_s11] sm:$0xff] %v1243_v58  }
 0x24c   : > { %1559 = shalt.err (!%p1556_p11)
}
 0x24d   : > { %s1560_s26 = scalar_lea.hbm %s1898_s7, 128  ;;  %s1564_s6 = scalar_lea.hbm %s1954_s5, 256 }
 0x24e   : > { %p1561_p0 = scmp.ne.s32.totalorder %s1898_s7, %s1560_s26  ;;  %p1565_p6 = scmp.lt.u32.totalorder %s1898_s7, %s1954_s5 }
 0x24f   : > { %p1566_p7 = scmp.lt.u32.totalorder %s1564_s6, %s1560_s26  ;;  %p1568_p8 = scmp.lt.u32.totalorder %s1560_s26, %s1898_s7 }
 0x250   : > { %p1562_p4 = pnand %p1561_p0, %p1971_p12 }
 0x251   : > { %p1567_p2 = por %p1566_p7, %p1565_p6 }
 0x252   : > { %p1563_p13 = pneg %p1562_p4 }
 0x253   : > { %p1569_p1 = por %p1568_p8, %p1567_p2 }
 0x255   : > { %p1570_p10 = pnand %p1569_p1, %p1563_p13 }
 0x257   : > { %1573 = shalt.err (!%p1570_p10)
}
 0x258   : > { %s1643_s10 = smov 64   ;;  %s1644_s16 = smov 4  }
 0x259   : > { %1299 = dma.vmem_to_hbm [thread:$0]  (%p1971_p12), %s1900_s13, 128, %s1898_s7, %s1019_s14, %s1643_s10, %s1643_s10, %s1644_s16  }
 0x25a PF: > { %s1047_s15 = sand.u32 1, %s1612_s18   ;;  %p1972_p3 = scmp.ne.s32.totalorder %s1963_s29, 0 }
 0x25b   : > { %p1973_p5 = scmp.ge.s32.totalorder %s1632_s23, 2  ;;  %s1048_s21 = scalar_lea.sflag [#allocation5], %s1047_s15 }
 0x25d   : > { %p1313_p9 = pnand %p1973_p5, %p1972_p3 }
 0x25f   : > { %1607 = dma.done.wait (!%p1313_p9), %s1048_s21, 128  }
 0x260   : > { %1609 = vsyncadd (!%p1313_p9), %s1048_s21, 4294967168  ;;  %s22_s23 = sadd.s32 1, %s1632_s23   ;;  %s1974_s18 = smov %s1616_s19 }
 0x261   : > { %p19_p11 = scmp.ge.s32.totalorder %s22_s23, 4   ;;  %s1975_s19 = smov %s1620_s20 }
 0x262   : > { %s1976_s20 = smov %s1820_s17  ;;  %s1977_s21 = smov %s1628_s22 }
 0x263   : > { %s1978_s22 = smov %s1980_s12  ;;  %21 = sbr.rel (!%p19_p11) target bundleno = 7 (0x7), region = 106 }
 0x26a   :  { %1053 = vsyncpa [#allocation4], 1 }
 0x26b   :  { %1055 = vsyncpa [#allocation4 + $0x1], 1 }
 0x26c   :  { %1056 = vsyncpa [#allocation7], 1 }
 0x26d   :  { %1057 = vsyncpa [#allocation5], 1 }
 0x26e   :  { %1059 = vsyncpa [#allocation5 + $0x1], 1 }

</bundles_post_ra>
